<compile_context>
chip_gen: v7x
topology: tpu7x:2x2x1
jax: 0.10.0
libtpu: 0.0.40
codegen_flags: <defaults>
</compile_context>

<pallas_src>
import math

import jax
import jax.numpy as jnp
from jax.experimental import pallas as pl
from jax.experimental.pallas import tpu as pltpu


def _round_up(x, m):
    return (x + m - 1) // m * m


def _conv_geometry(kernel_size, dilation):
    if kernel_size % 2 == 0:
        padding = kernel_size // 2 * dilation
        shift = True
    else:
        padding = (kernel_size - 1) // 2 * dilation
        shift = False
    return padding, shift


def conv1d_pallas(x, weight, bias, *, kernel_size, dilation=1,
                  seq_tile=256, weight_tile_budget_bytes=8 * 1024 * 1024):
    """Forward pass matching the PyTorch Conv1d module.

    Args:
      x:      (B, L, H) float32 input embeddings.
      weight: (H_out, H_in, K) torch-layout conv weight (H_out == H_in == H).
      bias:   (H,) conv bias.
    Returns:
      (B, L_out, H) conv output; for even kernel_size the leading time step is
      dropped (folded into the kernel), exactly like the torch module's `[:, 1:]`.
    """
    B, L, H = x.shape
    K = kernel_size
    d = dilation
    padding, shift = _conv_geometry(K, d)
    s = 1 if shift else 0                             # folded "[:, 1:]" offset
    L_out = L + 2 * padding - d * (K - 1) - s         # final output length

    # ---- tile geometry ---------------------------------------------------
    SUB = 16                                          # sublane align, safe for bf16 blocks
    Hp = _round_up(H, 128)                            # lane-dense hidden size
    halo = s + d * (K - 1)                            # extra input rows needed per seq tile
    halo_pad = _round_up(max(halo, 1), SUB)
    tl = min(seq_tile, _round_up(L_out, SUB))
    tl = max(_round_up(tl, halo_pad), halo_pad)       # tl % halo_pad == 0 and tl >= halo
    n_l = (L_out + tl - 1) // tl
    L_out_p = n_l * tl
    L_in_p = (n_l + 1) * tl                           # spare tile so the last halo block is in-bounds
    r = tl // halo_pad

    # Output-channel tile: keep full Hp unless resident bf16 weights get large.
    cands = [c for c in range(128, Hp + 1, 128) if Hp % c == 0]
    fits = [c for c in cands if K * Hp * c * 2 <= weight_tile_budget_bytes]
    tn = max(fits) if fits else min(cands)
    n_j = Hp // tn

    # ---- glue: one fused pad+cast pass over x; weight/bias re-layout is tiny ----
    # TODO(synk): fold the zero padding into the kernel with masked boundary taps
    # to remove this remaining extra HBM pass over x.
    x_p = jnp.pad(x, ((0, 0), (padding, L_in_p - padding - L), (0, Hp - H)))
    x_p = x_p.astype(jnp.bfloat16)
    w_taps = jnp.transpose(weight, (2, 1, 0))                          # (K, H_in, H_out)
    w_taps = jnp.pad(w_taps, ((0, 0), (0, Hp - H), (0, Hp - H))).astype(jnp.bfloat16)
    bias_p = jnp.pad(bias.astype(jnp.float32), (0, Hp - H)).reshape(1, Hp)

    def kernel(xa_ref, xh_ref, w_ref, b_ref, o_ref, win_ref):
        # xa_ref : (1, tl, Hp) bf16        current sequence tile
        # xh_ref : (1, halo_pad, Hp) bf16  leading rows of the next tile (halo)
        # w_ref  : (K, Hp, tn) bf16        per-tap weights for this channel tile
        # b_ref  : (1, tn) f32             bias slice
        # o_ref  : (1, tl, tn)             output tile
        # win_ref: (tl + halo_pad, Hp) bf16 scratch: tile ++ halo
        win_ref[pl.ds(0, tl), :] = xa_ref[0]
        if halo > 0:
            win_ref[pl.ds(tl, halo_pad), :] = xh_ref[0]
        # bias-initialized f32 accumulator (no separate add pass)
        acc = jnp.broadcast_to(b_ref[...], (tl, tn)).astype(jnp.float32)
        for k in range(K):                            # K is small: static unroll
            xs = win_ref[pl.ds(s + d * k, tl), :]     # (tl, Hp) shifted window
            acc = acc + jnp.dot(xs, w_ref[k],
                                preferred_element_type=jnp.float32)
        o_ref[0] = acc.astype(o_ref.dtype)

    out = pl.pallas_call(
        kernel,
        out_shape=jax.ShapeDtypeStruct((B, L_out_p, Hp), x.dtype),
        grid=(B, n_j, n_l),
        in_specs=[
            pl.BlockSpec((1, tl, Hp), lambda b, j, i: (b, i, 0)),
            pl.BlockSpec((1, halo_pad, Hp), lambda b, j, i: (b, (i + 1) * r, 0)),
            pl.BlockSpec((K, Hp, tn), lambda b, j, i: (0, 0, j)),
            pl.BlockSpec((1, tn), lambda b, j, i: (0, j)),
        ],
        out_specs=pl.BlockSpec((1, tl, tn), lambda b, j, i: (b, i, j)),
        scratch_shapes=[pltpu.VMEM((tl + halo_pad, Hp), jnp.bfloat16)],
        compiler_params=pltpu.CompilerParams(
            dimension_semantics=("parallel", "parallel", "parallel"),
            vmem_limit_bytes=48 * 1024 * 1024),
    )(x_p, x_p, w_taps, bias_p)

    if L_out_p != L_out or Hp != H:
        out = out[:, :L_out, :H]
    return out


def conv1d_reference(x, weight, bias, *, kernel_size, dilation=1,
                     quantize_operands=True):
    """Pure-JAX reference with identical semantics (bf16 matmul operands mirrored)."""
    padding, shift = _conv_geometry(kernel_size, dilation)
    if quantize_operands:
        x = x.astype(jnp.bfloat16).astype(jnp.float32)
        weight = weight.astype(jnp.bfloat16).astype(jnp.float32)
    y = jax.lax.conv_general_dilated(
        x.transpose(0, 2, 1), weight,
        window_strides=(1,), padding=[(padding, padding)],
        rhs_dilation=(dilation,), dimension_numbers=("NCH", "OIH", "NCH"),
        preferred_element_type=jnp.float32)
    y = y + bias[None, :, None].astype(jnp.float32)
    y = y.transpose(0, 2, 1)
    if shift:
        y = y[:, 1:]
    return y


def init_params(key, hidden_size, kernel_size):
    """Deterministic init matching the module: xavier_uniform_ weight, zero bias."""
    fan_in = hidden_size * kernel_size
    fan_out = hidden_size * kernel_size
    bound = math.sqrt(6.0 / (fan_in + fan_out))
    weight = jax.random.uniform(
        key, (hidden_size, hidden_size, kernel_size),
        minval=-bound, maxval=bound, dtype=jnp.float32)
    bias = jnp.zeros((hidden_size,), jnp.float32)
    return weight, bias


if __name__ == "__main__":
    B, L, H = 2, 16, 32
    key = jax.random.PRNGKey(0)
    k_x, k_w, k_b = jax.random.split(key, 3)
    x = jax.random.normal(k_x, (B, L, H), dtype=jnp.float32)

    # Exercise the odd-kernel, even-kernel (folded shift), and dilated paths.
    for kernel_size, dilation in ((3, 1), (4, 1), (3, 2)):
        weight, _ = init_params(
            jax.random.fold_in(k_w, 10 * kernel_size + dilation), H, kernel_size)
        # Non-zero bias so the fused bias path is actually verified.
        bias = 0.1 * jax.random.normal(
            jax.random.fold_in(k_b, kernel_size), (H,), dtype=jnp.float32)

        out = conv1d_pallas(x, weight, bias,
                            kernel_size=kernel_size, dilation=dilation)
        out = jax.block_until_ready(out)

        ref = conv1d_reference(x, weight, bias,
                               kernel_size=kernel_size, dilation=dilation)
        assert out.shape == ref.shape, (kernel_size, dilation, out.shape, ref.shape)
        assert jnp.allclose(out, ref, atol=1e-3, rtol=1e-3), \
            f"mismatch vs reference for kernel_size={kernel_size} dilation={dilation}"

    print("KERNEL_OK")
</pallas_src>

<mosaic_0001>
module attributes {stable_mosaic.version = 11 : i64} {
  func.func @kernel(%arg0: i32, %arg1: i32, %arg2: i32, %arg3: memref<1x16x128xbf16, #tpu.memory_space<vmem>>, %arg4: memref<1x16x128xbf16, #tpu.memory_space<vmem>>, %arg5: memref<3x128x128xbf16, #tpu.memory_space<vmem>>, %arg6: memref<1x128xf32, #tpu.memory_space<vmem>>, %arg7: memref<1x16x128xf32, #tpu.memory_space<vmem>>, %arg8: memref<32x128xbf16, #tpu.memory_space<vmem>>) attributes {dimension_semantics = [#tpu.dimension_semantics<parallel>, #tpu.dimension_semantics<parallel>, #tpu.dimension_semantics<parallel>], iteration_bounds = array<i64: 2, 1, 1>, scalar_prefetch = 0 : i64, scratch_operands = 1 : i64, tpu.core_type = #tpu.core_type<tc>, window_params = [{transform_indices = @transform_0, window_bounds = array<i64: 1, 16, 128>}, {transform_indices = @transform_1, window_bounds = array<i64: 1, 16, 128>}, {transform_indices = @transform_2, window_bounds = array<i64: 3, 128, 128>}, {transform_indices = @transform_3, window_bounds = array<i64: 1, 128>}, {transform_indices = @transform_4, window_bounds = array<i64: 1, 16, 128>}]} {
    %c0 = arith.constant 0 : index
    %c0_0 = arith.constant 0 : index
    %c0_1 = arith.constant 0 : index
    %0 = vector.load %arg3[%c0, %c0_0, %c0_1] : memref<1x16x128xbf16, #tpu.memory_space<vmem>>, vector<1x16x128xbf16>
    %1 = vector.shape_cast %0 : vector<1x16x128xbf16> to vector<16x128xbf16>
    %c0_2 = arith.constant 0 : index
    %c0_3 = arith.constant 0 : index
    %2 = vector.load %arg8[%c0_2, %c0_3] : memref<32x128xbf16, #tpu.memory_space<vmem>>, vector<16x128xbf16>
    tpu.vector_store %arg8[%c0_2, %c0_3], %1 {strides = array<i32>} : memref<32x128xbf16, #tpu.memory_space<vmem>>, vector<16x128xbf16>,
    %c0_4 = arith.constant 0 : index
    %c0_5 = arith.constant 0 : index
    %c0_6 = arith.constant 0 : index
    %3 = vector.load %arg4[%c0_4, %c0_5, %c0_6] : memref<1x16x128xbf16, #tpu.memory_space<vmem>>, vector<1x16x128xbf16>
    %4 = vector.shape_cast %3 : vector<1x16x128xbf16> to vector<16x128xbf16>
    %c16 = arith.constant 16 : index
    %c0_7 = arith.constant 0 : index
    %5 = vector.load %arg8[%c16, %c0_7] : memref<32x128xbf16, #tpu.memory_space<vmem>>, vector<16x128xbf16>
    tpu.vector_store %arg8[%c16, %c0_7], %4 {strides = array<i32>} : memref<32x128xbf16, #tpu.memory_space<vmem>>, vector<16x128xbf16>,
    %c0_8 = arith.constant 0 : index
    %c0_9 = arith.constant 0 : index
    %6 = vector.load %arg6[%c0_8, %c0_9] : memref<1x128xf32, #tpu.memory_space<vmem>>, vector<1x128xf32>
    %7 = vector.shape_cast %6 : vector<1x128xf32> to vector<1x128xf32>
    %8 = vector.broadcast %7 : vector<1x128xf32> to vector<16x128xf32>
    %c0_10 = arith.constant 0 : index
    %c0_11 = arith.constant 0 : index
    %9 = vector.load %arg8[%c0_10, %c0_11] : memref<32x128xbf16, #tpu.memory_space<vmem>>, vector<16x128xbf16>
    %c0_12 = arith.constant 0 : index
    %c0_13 = arith.constant 0 : index
    %c0_14 = arith.constant 0 : index
    %10 = vector.load %arg5[%c0_12, %c0_13, %c0_14] : memref<3x128x128xbf16, #tpu.memory_space<vmem>>, vector<1x128x128xbf16>
    %11 = vector.shape_cast %10 : vector<1x128x128xbf16> to vector<128x128xbf16>
    %cst = arith.constant dense<0.000000e+00> : vector<16x128xf32>
    %12 = tpu.matmul %9, %11, %cst {dimension_numbers = #tpu.dot_dimension_numbers<[1], [0], [0], [1], [0, 0, 1, 1], [], []>} : vector<16x128xbf16>, vector<128x128xbf16>, vector<16x128xf32> -> vector<16x128xf32>
    %13 = arith.addf %8, %12 : vector<16x128xf32>
    %c1 = arith.constant 1 : index
    %c0_15 = arith.constant 0 : index
    %14 = vector.load %arg8[%c1, %c0_15] : memref<32x128xbf16, #tpu.memory_space<vmem>>, vector<16x128xbf16>
    %c1_16 = arith.constant 1 : index
    %c0_17 = arith.constant 0 : index
    %c0_18 = arith.constant 0 : index
    %15 = vector.load %arg5[%c1_16, %c0_17, %c0_18] : memref<3x128x128xbf16, #tpu.memory_space<vmem>>, vector<1x128x128xbf16>
    %16 = vector.shape_cast %15 : vector<1x128x128xbf16> to vector<128x128xbf16>
    %cst_19 = arith.constant dense<0.000000e+00> : vector<16x128xf32>
    %17 = tpu.matmul %14, %16, %cst_19 {dimension_numbers = #tpu.dot_dimension_numbers<[1], [0], [0], [1], [0, 0, 1, 1], [], []>} : vector<16x128xbf16>, vector<128x128xbf16>, vector<16x128xf32> -> vector<16x128xf32>
    %18 = arith.addf %13, %17 : vector<16x128xf32>
    %c2 = arith.constant 2 : index
    %c0_20 = arith.constant 0 : index
    %19 = vector.load %arg8[%c2, %c0_20] : memref<32x128xbf16, #tpu.memory_space<vmem>>, vector<16x128xbf16>
    %c2_21 = arith.constant 2 : index
    %c0_22 = arith.constant 0 : index
    %c0_23 = arith.constant 0 : index
    %20 = vector.load %arg5[%c2_21, %c0_22, %c0_23] : memref<3x128x128xbf16, #tpu.memory_space<vmem>>, vector<1x128x128xbf16>
    %21 = vector.shape_cast %20 : vector<1x128x128xbf16> to vector<128x128xbf16>
    %cst_24 = arith.constant dense<0.000000e+00> : vector<16x128xf32>
    %22 = tpu.matmul %19, %21, %cst_24 {dimension_numbers = #tpu.dot_dimension_numbers<[1], [0], [0], [1], [0, 0, 1, 1], [], []>} : vector<16x128xbf16>, vector<128x128xbf16>, vector<16x128xf32> -> vector<16x128xf32>
    %23 = arith.addf %18, %22 : vector<16x128xf32>
    %c0_25 = arith.constant 0 : index
    %c0_26 = arith.constant 0 : index
    %c0_27 = arith.constant 0 : index
    %24 = vector.load %arg7[%c0_25, %c0_26, %c0_27] : memref<1x16x128xf32, #tpu.memory_space<vmem>>, vector<1x16x128xf32>
    %25 = vector.shape_cast %24 : vector<1x16x128xf32> to vector<16x128xf32>
    %26 = vector.shape_cast %23 : vector<16x128xf32> to vector<1x16x128xf32>
    tpu.vector_store %arg7[%c0_25, %c0_26, %c0_27], %26 {strides = array<i32>} : memref<1x16x128xf32, #tpu.memory_space<vmem>>, vector<1x16x128xf32>,
    return
  }
  func.func @transform_0(%arg0: i32, %arg1: i32, %arg2: i32) -> (i32, i32, i32) {
    %c0_i32 = arith.constant 0 : i32
    %c0_i32_0 = arith.constant 0 : i32
    return %arg0, %arg2, %c0_i32 : i32, i32, i32
  }
  func.func @transform_1(%arg0: i32, %arg1: i32, %arg2: i32) -> (i32, i32, i32) {
    %c1_i32 = arith.constant 1 : i32
    %0 = arith.addi %arg2, %c1_i32 : i32
    %c1_i32_0 = arith.constant 1 : i32
    %1 = arith.muli %0, %c1_i32_0 : i32
    %c0_i32 = arith.constant 0 : i32
    %c0_i32_1 = arith.constant 0 : i32
    return %arg0, %1, %c0_i32 : i32, i32, i32
  }
  func.func @transform_2(%arg0: i32, %arg1: i32, %arg2: i32) -> (i32, i32, i32) {
    %c0_i32 = arith.constant 0 : i32
    %c0_i32_0 = arith.constant 0 : i32
    %c0_i32_1 = arith.constant 0 : i32
    return %c0_i32, %c0_i32_0, %arg1 : i32, i32, i32
  }
  func.func @transform_3(%arg0: i32, %arg1: i32, %arg2: i32) -> (i32, i32) {
    %c0_i32 = arith.constant 0 : i32
    %c0_i32_0 = arith.constant 0 : i32
    return %c0_i32, %arg1 : i32, i32
  }
  func.func @transform_4(%arg0: i32, %arg1: i32, %arg2: i32) -> (i32, i32, i32) {
    %c0_i32 = arith.constant 0 : i32
    return %arg0, %arg2, %arg1 : i32, i32, i32
  }
}

</mosaic_0001>

<bundles_post_ra>
// kernel: tpu_custom_call.1
= control target key start
LH: loop header
LB: loop body
LE: loop exit
PB: predicated region body
PF: predicated region fallthrough
CT: control target
= control target key end

     0   :  { %s1640_s0 = inlined_call_operand.hbm [shape: bf16[2,32,128], index: 0, kind: input, shape index: {}]   ;;  %s1641_s1 = inlined_call_operand.hbm [shape: bf16[2,32,128], index: 1, kind: input, shape index: {}]   ;;  %s1642_s2 = inlined_call_operand.hbm [shape: bf16[3,128,128], index: 2, kind: input, shape index: {}]   ;;  %s1643_s3 = inlined_call_operand.vmem [shape: f32[1,128], index: 3, kind: input, shape index: {}]   ;;  %s1644_s4 = inlined_call_operand.hbm [shape: f32[2,16,128], index: 4, kind: output, shape index: {}]  }
   0x1   :  { %1655 = sst [smem:[#allocation18_spill]] %s1640_s0 }
   0x2   :  { %1656 = sst [smem:[#allocation19_spill]] %s1642_s2 }
   0x3   :  { %9 = vsyncpa [#allocation4], 0 }
   0x4   :  { %11 = vsyncpa [#allocation4 + $0x1], 0 }
   0x5   :  { %12 = vsyncpa [#allocation7], 0 }
   0x6   :  { %14 = vsyncpa [#allocation7 + $0x1], 0 }
   0x7   :  { %15 = vsyncpa [#allocation5], 0 }
   0x8   :  { %17 = vsyncpa [#allocation5 + $0x1], 0  ;;  %s1336_s15 = smov 0   ;;  %s1338_s16 = smov 0  }
   0x9   :  { %s1340_s17 = smov 0   ;;  %s1342_s18 = smov 0  }
   0xa   :  { %s1344_s19 = smov 0   ;;  %s1346_s20 = smov 0  }
   0xb LB: > { %1657 = sst [smem:[#allocation14_spill]] %s1287_s17  ;;  %s1367_s21 = sadd.s32 4294967295, %s1299_s20   ;;  %s1299_s20 = sphi %s1346_s20, %s23_s20   ;;  %s1295_s19 = sphi %s1344_s19, %s1682_s19   ;;  %s1291_s18 = sphi %s1342_s18, %s1681_s18   ;;  %s1287_s17 = sphi %s1340_s17, %s1680_s17   ;;  %s1283_s16 = sphi %s1338_s16, %s1684_s16   ;;  %s1279_s15 = sphi %s1336_s15, %s1683_s15  }
   0xc   : > { %1658 = sst [smem:[#allocation15_spill]] %s1295_s19  ;;  %s864_s22 = sadd.s32 4294967294, %s1299_s20  }
   0xd   : > { %p64_p0 = scmp.ne.s32.totalorder %s1283_s16, %s1279_s15  ;;  %p1645_p1 = scmp.eq.s32.totalorder %s1367_s21, 0 }
   0xe   : > { %p180_p3 = scmp.eq.s32.totalorder %s864_s22, 1  ;;  %p865_p5 = scmp.ge.s32.totalorder %s1299_s20, 1 }
   0xf   : > { %p1376_p4 = por %p1645_p1, %p64_p0  ;;  %p187_p7 = scmp.lt.s32.totalorder %s1299_s20, 3 }
  0x10   : > { %p1381_p6 = por %p180_p3, %p64_p0  ;;  %s1301_s26 = smov [#allocation8]  }
  0x11   : > { %s1659_s23 = scalar_select %p1376_p4, 1, 0 }
  0x12   : > { %s1660_s24 = scalar_select %p1381_p6, 1, 0 }
  0x13   : > { %p1386_p8 = pnand %p865_p5, %p187_p7  ;;  %s201_s27 = sshll.u32 %s1301_s26, 4  ;;  %s202_s27 = int_to_ptr.vmem [resolvable:$true] %s201_s27 }
  0x14   : > { %s42_s29 = sadd.s32 1, %s1295_s19  ;;  %s1663_s2 = sld [smem:[#allocation19_spill]] }
  0x15   : > { %s1661_s25 = scalar_select %p1386_p8, 1, 0 }
  0x16   : > { %p1020_p9 = pneg %p1386_p8 }
  0x18   : > { %p1395_p11 = pnand %p1020_p9, %p1645_p1 }
  0x1a   : > { %s1120_s6 = scalar_lea.hbm %s1663_s2, 3072  ;;  %p1122_p13 = pneg %p1395_p11 }
  0x1b   : > { %p1121_p12 = scmp.ne.s32.totalorder %s1663_s2, %s1120_s6  ;;  %p1127_p5 = scmp.lt.u32.totalorder %s1120_s6, %s1663_s2 }
  0x1d   : > { %p1123_p0 = pnand %p1122_p13, %p1121_p12 }
  0x1f   : > { %p1124_p3 = pneg %p1123_p0 }
  0x21   : > { %p1129_p7 = pnand %p1127_p5, %p1124_p3 }
  0x23   : > { %1132 = shalt.err (!%p1129_p7)
}
  0x24   : > { %s1133_s11 = scalar_lea.vmem %s202_s27, 3072  ;;  %p1141_p2 = scmp.lt.s32.totalorder %s202_s27, %s202_s27 }
  0x25   : > { %p1134_p9 = scmp.ne.s32.totalorder %s202_s27, %s1133_s11  ;;  %p1142_p6 = scmp.lt.s32.totalorder %s1133_s11, %s1133_s11 }
  0x27   : > { %p1136_p10 = pnand %p1134_p9, %p1122_p13  ;;  %p1143_p4 = por %p1142_p6, %p1141_p2 }
  0x29   : > { %p1137_p1 = pneg %p1136_p10 }
  0x2b   : > { %p1144_p8 = pnand %p1143_p4, %p1137_p1 }
  0x2d   : > { %1147 = shalt.err (!%p1144_p8)
}
  0x2e   : > { %s1648_s12 = smov 64   ;;  %s1650_s13 = smov 4  }
  0x2f   : > { %1023 = dma.hbm_to_vmem [thread:$0]  (!%p1395_p11), %s1663_s2, 3072, %s202_s27, [#allocation7], %s1648_s12, %s1648_s12, %s1650_s13  }
  0x30   : > { %p44_p1 = scmp.ge.s32.totalorder %s42_s29, 2  ;;  %s51_s26 = sadd.s32 1, %s1287_s17 }
  0x31   : > { %p58_p2 = scmp.ne.s32.totalorder %s1287_s17, %s1283_s16  ;;  %p59_p4 = scmp.eq.s32.totalorder %s1299_s20, 0 }
  0x32   : > { %s1686_s29 = smov (%p44_p1, %s42_s29), 0  ;;  %p1666_p8 = scmp.eq.s32.totalorder %s1367_s21, 1 }
  0x33   : > { %1664 = sst [smem:[#allocation16_spill]] %s1686_s29  ;;  %p1425_p6 = por %p59_p4, %p58_p2 }
  0x34   : > { %p1431_p10 = por %p1666_p8, %p58_p2  ;;  %s46_s5 = ssub.s32 %s1295_s19, %s1686_s29 }
  0x35   : > { %p1036_p12 = scmp.lt.s32.totalorder %s1299_s20, 2  ;;  %p49_p11 = scmp.eq.s32.totalorder %s46_s5, 0 }
  0x36   : > { %s221_s27 = sand.u32 1, %s1287_s17   ;;  %s912_s8 = sshll.u32 %s1295_s19, 8 }
  0x37   : > { %s1439_s6 = sshll.u32 %s221_s27, 3  ;;  %s1669_s0 = sld [smem:[#allocation18_spill]] }
  0x38   : > { %s1442_s7 = scalar_select %p49_p11, %s1287_s17, %s51_s26  }
  0x39   : > { %s225_s14 = scalar_lea.vmem [#allocation3], %s1439_s6  ;;  %p1455_p13 = pnand %p1036_p12, %p1425_p6 }
  0x3a   : > { %1668 = sst [smem:[#allocation17_spill]] %s1442_s7  ;;  %s234_s22 = sshll.u32 %s225_s14, 4  ;;  %s1451_s22 = int_to_ptr.vmem [resolvable:$true] %s234_s22 }
  0x3b   : > { %s1462_s9 = scalar_lea.hbm %s1641_s1, %s912_s8  ;;  %s1467_s13 = scalar_lea.sflag [#allocation4], %s221_s27 }
  0x3c   : > { %s1465_s10 = scalar_lea.hbm %s1462_s9, 128  ;;  %p1150_p3 = pneg %p1455_p13 }
  0x3d   : > { %s1448_s11 = scalar_lea.hbm %s1669_s0, %s912_s8  ;;  %s1153_s12 = scalar_lea.hbm %s1669_s0, 512 }
  0x3e   : > { %s1148_s14 = scalar_lea.hbm %s1448_s11, 128  ;;  %p1154_p9 = scmp.lt.u32.totalorder %s1448_s11, %s1669_s0 }
  0x3f   : > { %p1149_p0 = scmp.ne.s32.totalorder %s1448_s11, %s1148_s14  ;;  %p1155_p1 = scmp.lt.u32.totalorder %s1153_s12, %s1148_s14 }
  0x40   : > { %p1157_p4 = scmp.lt.u32.totalorder %s1148_s14, %s1448_s11 }
  0x41   : > { %p1151_p5 = pnand %p1150_p3, %p1149_p0  ;;  %p1156_p2 = por %p1155_p1, %p1154_p9 }
  0x43   : > { %p1152_p7 = pneg %p1151_p5  ;;  %p1158_p6 = por %p1157_p4, %p1156_p2 }
  0x45   : > { %p1159_p8 = pnand %p1158_p6, %p1152_p7 }
  0x47   : > { %1162 = shalt.err (!%p1159_p8)
}
  0x48   : > { %s1163_s27 = scalar_lea.vmem %s1451_s22, 128  ;;  %s1304_s2 = smov [#allocation3]  }
  0x49   : > { %p1164_p12 = scmp.ne.s32.totalorder %s1451_s22, %s1163_s27  ;;  %s1168_s30 = sshll.u32 %s1304_s2, 4  ;;  %s1169_s30 = int_to_ptr.vmem [resolvable:$false] %s1168_s30 }
  0x4a   : > { %s1170_s26 = scalar_lea.vmem %s1169_s30, 256  ;;  %p1171_p5 = scmp.lt.s32.totalorder %s1451_s22, %s1169_s30 }
  0x4b   : > { %p1166_p11 = pnand %p1164_p12, %p1150_p3  ;;  %p1172_p9 = scmp.lt.s32.totalorder %s1170_s26, %s1163_s27 }
  0x4d   : > { %p1167_p0 = pneg %p1166_p11  ;;  %p1173_p1 = por %p1172_p9, %p1171_p5 }
  0x4f   : > { %p1174_p2 = pnand %p1173_p1, %p1167_p0 }
  0x51   : > { %1177 = shalt.err (!%p1174_p2)
}
  0x52   : > { %s1671_s14 = smov 4   ;;  %s1672_s12 = smov 64  }
  0x53   : > { %1027 = dma.hbm_to_vmem [thread:$0]  (!%p1455_p13), %s1448_s11, 128, %s1451_s22, %s1467_s13, %s1672_s12, %s1672_s12, %s1671_s14  }
  0x54   : > { %s248_s8 = scalar_lea.vmem [#allocation6], %s1439_s6  ;;  %s244_s2 = sand.u32 1, %s1299_s20  }
  0x55   : > { %s258_s27 = sshll.u32 %s248_s8, 4  ;;  %s1502_s30 = scalar_lea.sflag [#allocation7], %s244_s2  ;;  %s1500_s27 = int_to_ptr.vmem [resolvable:$true] %s258_s27 }
  0x56   : > { %s1208_s26 = scalar_lea.hbm %s1462_s9, 256  ;;  %s1183_s19 = scalar_lea.hbm %s1641_s1, 512 }
  0x57   : > { %p1179_p7 = scmp.ne.s32.totalorder %s1465_s10, %s1208_s26  ;;  %p1184_p8 = scmp.lt.u32.totalorder %s1465_s10, %s1641_s1 }
  0x58   : > { %p1185_p12 = scmp.lt.u32.totalorder %s1183_s19, %s1208_s26  ;;  %p1187_p0 = scmp.lt.u32.totalorder %s1208_s26, %s1465_s10 }
  0x59   : > { %p1181_p4 = pnand %p1179_p7, %p1150_p3 }
  0x5a   : > { %p1186_p11 = por %p1185_p12, %p1184_p8 }
  0x5b   : > { %p1182_p6 = pneg %p1181_p4 }
  0x5c   : > { %p1188_p5 = por %p1187_p0, %p1186_p11 }
  0x5e   : > { %p1189_p9 = pnand %p1188_p5, %p1182_p6 }
  0x60   : > { %1192 = shalt.err (!%p1189_p9)
}
  0x61   : > { %s1193_s13 = scalar_lea.vmem %s1500_s27, 128  ;;  %s1305_s0 = smov [#allocation6]  }
  0x62   : > { %p1194_p1 = scmp.ne.s32.totalorder %s1500_s27, %s1193_s13  ;;  %s1198_s29 = sshll.u32 %s1305_s0, 4  ;;  %s1199_s29 = int_to_ptr.vmem [resolvable:$false] %s1198_s29 }
  0x63   : > { %s1200_s17 = scalar_lea.vmem %s1199_s29, 256  ;;  %p1201_p4 = scmp.lt.s32.totalorder %s1500_s27, %s1199_s29 }
  0x64   : > { %p1196_p2 = pnand %p1194_p1, %p1150_p3  ;;  %p1202_p8 = scmp.lt.s32.totalorder %s1200_s17, %s1193_s13 }
  0x66   : > { %p1197_p7 = pneg %p1196_p2  ;;  %p1203_p12 = por %p1202_p8, %p1201_p4 }
  0x68   : > { %p1204_p11 = pnand %p1203_p12, %p1197_p7 }
  0x6a   : > { %1207 = shalt.err (!%p1204_p11)
}
  0x6b   : > { %1030 = dma.hbm_to_vmem [thread:$0]  (!%p1455_p13), %s1465_s10, 128, %s1500_s27, %s1502_s30, %s1672_s12, %s1672_s12, %s1671_s14  }
  0x6c   : > { %p1673_p3 = scmp.ne.s32.totalorder %s1661_s25, 0 }
  0x6d   : > { %s1534_s19 = sand.u32 (!%p1673_p3), 1, %s1283_s16   ;;  %p1674_p6 = scmp.ne.s32.totalorder (!%p1673_p3), %s1659_s23, 0 }
  0x6e   : > { %270 = sbr.rel (%p1673_p3) target bundleno = 421 (0x1a5), region = 36  ;;  %s876_s6 = sshll.u32 (!%p1673_p3), %s1534_s19, 3 }
  0x6f   : > { %s273_s7 = scalar_lea.sflag (!%p1673_p3), [#allocation4], %s1534_s19  ;;  %s276_s11 = scalar_lea.vmem (!%p1673_p3), [#allocation3], %s876_s6 }
  0x75   : > { %1262 = dma.done.wait (%p1674_p6), %s273_s7, 128  }
  0x76   : > { %1264 = vsyncadd (%p1674_p6), %s273_s7, 4294967168  ;;  %s281_s22 = sand.u32 1, %s1367_s21   ;;  %s285_s25 = scalar_lea.vmem [#allocation6], %s876_s6 }
  0x77   : > { %s282_s5 = scalar_lea.sflag [#allocation7], %s281_s22 }
  0x78   : > { %1266 = dma.done.wait (%p1674_p6), %s282_s5, 128  }
  0x79   : > { %1268 = vsyncadd (%p1674_p6), %s282_s5, 4294967168  ;;  %p1675_p13 = scmp.eq.s32.totalorder %s1367_s21, 0 }
  0x7b   : > { %1270 = dma.done.wait (%p1675_p13), [#allocation7], 3072   ;;  %p1676_p0 = pmov %p1675_p13 }
  0x7c   : > { %v1306_v0 = vmov 0.0   ;;  %vm1307_vm0 = vmmov 0   ;;  %v1094_v1 = vld [vmem:[#allocation8 + $0x40] sm:$0xff]   ;;  %v1095_v2 = vld [vmem:[#allocation8 + $0x48] sm:$0xff]   ;;  %v1096_v3 = vld [vmem:[#allocation8 + $0x50] sm:$0xff]   ;;  %vm607_vm2 = vcmask 1046528  }
  0x7d   : > { %1272 = vsyncadd (%p1676_p0), [#allocation7], 4294964224  ;;  %962 = vmatprep.subr.bf16.mxu0 %v1306_v0  ;;  %942 = vmatprep.subr.bf16.mxu1 %v1306_v0  ;;  %v1101_v4 = vld [vmem:[#allocation8] sm:$0xff]   ;;  %v1097_v5 = vld [vmem:[#allocation8 + $0x58] sm:$0xff]   ;;  %vm482_vm1 = vsmask.f32 7424 }
  0x7e   : > { %978 = vmatprep.mubr.msk.bf16.mxu0 %vm1307_vm0, %v1306_v0  ;;  %958 = vmatprep.mubr.msk.bf16.mxu1 %vm1307_vm0, %v1306_v0  ;;  %v1103_v6 = vld [vmem:[#allocation8 + $0x8] sm:$0xff]   ;;  %v1105_v8 = vld [vmem:[%s285_s25] sm:$0xff]   ;;  %v1098_v9 = vld [vmem:[#allocation8 + $0x60] sm:$0xff]   ;;  %s879_s21 = sshll.u32 %s1534_s19, 4  ;;  %s914_s12 = sshll.u32 %s1291_s18, 8 }
  0x7f   : > { %963 = vmatpush3.bf16.msra.mxu0 %v1094_v1  ;;  %943 = vmatpush3.bf16.msra.mxu1 %v1101_v4  ;;  %v1104_v7 = vld [vmem:[%s276_s11] sm:$0xff]   ;;  %347 = vst [vmem:[#allocation2 + $0x8] sm:$0xff] %v1105_v8  ;;  %v1107_v10 = vld [vmem:[#allocation8 + $0x10] sm:$0xff]   ;;  %v1109_v11 = vld [vmem:[#allocation8 + $0x18] sm:$0xff]   ;;  %s321_s10 = scalar_lea.vmem [#allocation9], %s879_s21  ;;  %s1591_s2 = scalar_lea.hbm %s1644_s4, %s914_s12 }
  0x80   : > { %964 = vmatprep.subr.bf16.mxu0 %v1306_v0  ;;  %944 = vmatprep.subr.bf16.mxu1 %v1306_v0  ;;  %338 = vst [vmem:[#allocation2] sm:$0xff] %v1104_v7  ;;  %v1099_v12 = vld [vmem:[#allocation8 + $0x68] sm:$0xff]   ;;  %v486_v13 = vshll.u32 %v1104_v7, 16  ;;  %v1100_v14 = vld [vmem:[#allocation8 + $0x70] sm:$0xff]   ;;  %v484_v16 = vshrl.u32 %v1104_v7, 16  ;;  %v1111_v17 = vld [vmem:[#allocation8 + $0x20] sm:$0xff]  }
  0x81   : > { %v1113_v20 = vld [vmem:[#allocation8 + $0x28] sm:$0xff]   ;;  %v1102_v21 = vld [vmem:[#allocation8 + $0x78] sm:$0xff]   ;;  %v1115_v24 = vld [vmem:[#allocation8 + $0x30] sm:$0xff]   ;;  %s722_s14 = sshll.u32 %s321_s10, 4  ;;  %s706_s18 = scalar_lea.sflag [#allocation5], %s1534_s19  ;;  %s1586_s14 = int_to_ptr.vmem [resolvable:$true] %s722_s14 }
  0x82   : > { %v488_v18 = vrot.slane %v486_v13, 1  ;;  %v1106_v26 = vld [vmem:[#allocation8 + $0x80] sm:$0xff]   ;;  %v1117_v27 = vld [vmem:[#allocation8 + $0x38] sm:$0xff]   ;;  %v1108_v28 = vld [vmem:[#allocation8 + $0x88] sm:$0xff]   ;;  %s1209_s30 = scalar_lea.vmem %s1586_s14, 256  ;;  %s1308_s26 = smov [#allocation9]  }
  0x83   : > { %965 = vmatpush3.bf16.msra.mxu0 %v1095_v2  ;;  %945 = vmatpush3.bf16.msra.mxu1 %v1103_v6  ;;  %v1110_v29 = vld [vmem:[#allocation8 + $0x90] sm:$0xff]   ;;  %v1112_v30 = vld [vmem:[#allocation8 + $0x98] sm:$0xff]   ;;  %v1114_v31 = vld [vmem:[#allocation8 + $0xa0] sm:$0xff]   ;;  %p1210_p5 = scmp.ne.s32.totalorder %s1586_s14, %s1209_s30  ;;  %s1213_s13 = sshll.u32 %s1308_s26, 4  ;;  %s1214_s13 = int_to_ptr.vmem [resolvable:$false] %s1213_s13 }
  0x84   : > { %966 = vmatprep.subr.bf16.mxu0 %v1306_v0  ;;  %946 = vmatprep.subr.bf16.mxu1 %v1306_v0  ;;  %v489_v22 = vor.u32 %v488_v18, %v484_v16  ;;  %v1116_v32 = vld [vmem:[#allocation8 + $0xa8] sm:$0xff]   ;;  %v1118_v33 = vld [vmem:[#allocation8 + $0xb0] sm:$0xff]   ;;  %v1119_v35 = vld [vmem:[#allocation8 + $0xb8] sm:$0xff]   ;;  %s1215_s0 = scalar_lea.vmem %s1214_s13, 512  ;;  %p1216_p2 = scmp.lt.s32.totalorder %s1586_s14, %s1214_s13 }
  0x85   : > { %v882_v43 = vld [vmem:[%s1643_s3] ss:$0 sm:$0xff]  ;;  %p1211_p9 = pnand %p1210_p5, %p1431_p10  ;;  %p1217_p7 = scmp.lt.s32.totalorder %s1215_s0, %s1209_s30 }
  0x86   : > { %v464_v15 = vld [vmem:[#allocation2 + $0x8] sm:$0x1] }
  0x87   : > { %967 = vmatpush3.bf16.msra.mxu0 %v1096_v3  ;;  %947 = vmatpush3.bf16.msra.mxu1 %v1107_v10  ;;  %v491_v19 = vshll.u32 %v464_v15, 16  ;;  %v587_v34 = vld [vmem:[#allocation2] sm:$0xfe]  ;;  %v609_v37 = vrot.slane %v464_v15, 1  ;;  %p1212_p1 = pneg %p1211_p9  ;;  %p1218_p4 = por %p1217_p7, %p1216_p2 }
  0x88   : > { %968 = vmatprep.subr.bf16.mxu0 %v1306_v0  ;;  %948 = vmatprep.subr.bf16.mxu1 %v1306_v0  ;;  %v608_v36 = vrot.slane %v587_v34, 1 }
  0x89   : > { %v493_v23 = vrot.slane %v491_v19, 1  ;;  %p1219_p8 = pnand %p1218_p4, %p1212_p1 }
  0x8a   : > { %v610_v38 = vsel %vm607_vm2, %v608_v36, %v609_v37 }
  0x8b   : > { %969 = vmatpush3.bf16.msra.mxu0 %v1097_v5  ;;  %949 = vmatpush3.bf16.msra.mxu1 %v1109_v11  ;;  %v494_v25 = vsel %vm482_vm1, %v489_v22, %v493_v23 }
  0x8c   : > { %970 = vmatprep.subr.bf16.mxu0 %v1306_v0  ;;  %950 = vmatprep.subr.bf16.mxu1 %v1306_v0 }
  0x8f   : > { %971 = vmatpush3.bf16.msra.mxu0 %v1098_v9  ;;  %951 = vmatpush3.bf16.msra.mxu1 %v1111_v17 }
  0x90   : > { %972 = vmatprep.subr.bf16.mxu0 %v1306_v0  ;;  %952 = vmatprep.subr.bf16.mxu1 %v1306_v0 }
  0x93   : > { %973 = vmatpush3.bf16.msra.mxu0 %v1099_v12  ;;  %953 = vmatpush3.bf16.msra.mxu1 %v1113_v20 }
  0x94   : > { %974 = vmatprep.subr.bf16.mxu0 %v1306_v0  ;;  %954 = vmatprep.subr.bf16.mxu1 %v1306_v0 }
  0x97   : > { %975 = vmatpush3.bf16.msra.mxu0 %v1100_v14  ;;  %955 = vmatpush3.bf16.msra.mxu1 %v1115_v24 }
  0x98   : > { %976 = vmatprep.subr.bf16.mxu0 %v1306_v0  ;;  %956 = vmatprep.subr.bf16.mxu1 %v1306_v0 }
  0x9b   : > { %977 = vmatpush3.bf16.msra.mxu0 %v1102_v21  ;;  %957 = vmatpush3.bf16.msra.mxu1 %v1117_v27 }
  0x9c   : > { %982 = vmatprep.subr.bf16.mxu0 %v1306_v0 }
  0x9e   : > { %979 = vmatmul.mubr.bf16.vlgmr.msra.gmra.mrb[0].mxu0 %v494_v25  ;;  %959 = vmatmul.mubr.bf16.vlgmr.msra.gmra.mrb[0].mxu1 %v1104_v7 }
  0x9f   : > { %983 = vmatpush3.bf16.msra.mxu0 %v1106_v26  ;;  %998 = vmatprep.mubr.msk.bf16.mxu0 %vm1307_vm0, %v1306_v0 }
  0xa0   : > { %984 = vmatprep.subr.bf16.mxu0 %v1306_v0 }
  0xa3   : > { %985 = vmatpush3.bf16.msra.mxu0 %v1108_v28 }
  0xa4   : > { %986 = vmatprep.subr.bf16.mxu0 %v1306_v0 }
  0xa7   : > { %987 = vmatpush3.bf16.msra.mxu0 %v1110_v29 }
  0xa8   : > { %988 = vmatprep.subr.bf16.mxu0 %v1306_v0 }
  0xab   : > { %989 = vmatpush3.bf16.msra.mxu0 %v1112_v30 }
  0xac   : > { %990 = vmatprep.subr.bf16.mxu0 %v1306_v0 }
  0xaf   : > { %991 = vmatpush3.bf16.msra.mxu0 %v1114_v31 }
  0xb0   : > { %992 = vmatprep.subr.bf16.mxu0 %v1306_v0 }
  0xb3   : > { %993 = vmatpush3.bf16.msra.mxu0 %v1116_v32 }
  0xb4   : > { %994 = vmatprep.subr.bf16.mxu0 %v1306_v0 }
  0xb7   : > { %995 = vmatpush3.bf16.msra.mxu0 %v1118_v33 }
  0xb8   : > { %996 = vmatprep.subr.bf16.mxu0 %v1306_v0 }
  0xbb   : > { %997 = vmatpush3.bf16.msra.mxu0 %v1119_v35 }
  0xbe   : > { %999 = vmatmul.mubr.bf16.vlgmr.msra.gmra.mrb[0].mxu0 %v610_v38 }
 0x171   : > { %v454_v39 = vpop.f32.mrb[0].mxu1 }
 0x172   : > { %v960_v40 = vpop.f32.mrb[1].mxu1  ;;  %v461_v44 = vadd.f32 %v882_v43, %v454_v39 }
 0x173   : > { %v457_v41 = vpop.f32.mrb[2].mxu1 }
 0x174   : > { %v961_v42 = vpop.f32.mrb[3].mxu1  ;;  %v462_v46 = vadd.f32 %v882_v43, %v457_v41 }
 0x191   : > { %v694_v45 = vpop.f32.mrb[0].mxu0 }
 0x192   : > { %v1003_v47 = vadd.f32 %v694_v45, %v461_v44  ;;  %v1000_v48 = vpop.f32.mrb[1].mxu0 }
 0x193   : > { %v697_v49 = vpop.f32.mrb[2].mxu0 }
 0x194   : > { %703 = vst [vmem:[%s321_s10] sm:$0xff] %v1003_v47  ;;  %v1005_v50 = vadd.f32 %v697_v49, %v462_v46  ;;  %v1001_v51 = vpop.f32.mrb[3].mxu0 }
 0x196   : > { %704 = vst [vmem:[%s321_s10 + $0x8] sm:$0xff] %v1005_v50 }
 0x197   : > { %1222 = shalt.err (!%p1219_p8)
}
 0x198   : > { %s1223_s29 = scalar_lea.hbm %s1591_s2, 256  ;;  %s1227_s7 = scalar_lea.hbm %s1644_s4, 512 }
 0x199   : > { %p1224_p12 = scmp.ne.s32.totalorder %s1591_s2, %s1223_s29  ;;  %p1228_p6 = scmp.lt.u32.totalorder %s1591_s2, %s1644_s4 }
 0x19a   : > { %p1229_p13 = scmp.lt.u32.totalorder %s1227_s7, %s1223_s29  ;;  %p1231_p5 = scmp.lt.u32.totalorder %s1223_s29, %s1591_s2 }
 0x19b   : > { %p1225_p11 = pnand %p1224_p12, %p1431_p10 }
 0x19c   : > { %p1230_p0 = por %p1229_p13, %p1228_p6 }
 0x19d   : > { %p1226_p3 = pneg %p1225_p11 }
 0x19e   : > { %p1232_p9 = por %p1231_p5, %p1230_p0 }
 0x1a0   : > { %p1233_p1 = pnand %p1232_p9, %p1226_p3 }
 0x1a2   : > { %1236 = shalt.err (!%p1233_p1)
}
 0x1a3   : > { %s1309_s5 = smov 128   ;;  %s1310_s25 = smov 8  }
 0x1a4   : > { %1018 = dma.vmem_to_hbm [thread:$0]  (%p1431_p10), %s1586_s14, 256, %s1591_s2, %s706_s18, %s1309_s5, %s1309_s5, %s1310_s25  }
 0x1a5 PF: > { %s737_s21 = sand.u32 1, %s1279_s15   ;;  %p1677_p2 = scmp.ne.s32.totalorder %s1660_s24, 0 }
 0x1a6   : > { %p1678_p7 = scmp.ge.s32.totalorder %s1299_s20, 2  ;;  %s738_s23 = scalar_lea.sflag [#allocation5], %s737_s21 }
 0x1a8   : > { %p1032_p4 = pnand %p1678_p7, %p1677_p2 }
 0x1aa   : > { %1274 = dma.done.wait (!%p1032_p4), %s738_s23, 256  }
 0x1ab   : > { %1276 = vsyncadd (!%p1032_p4), %s738_s23, 4294967040  ;;  %s23_s20 = sadd.s32 1, %s1299_s20   ;;  %s1679_s9 = sld [smem:[#allocation14_spill]] }
 0x1ac   : > { %p20_p8 = scmp.ge.s32.totalorder %s23_s20, 4   ;;  %s1680_s17 = sld [smem:[#allocation17_spill]] }
 0x1ad   : > { %s1681_s18 = sld [smem:[#allocation15_spill]]  ;;  %s1682_s19 = sld [smem:[#allocation16_spill]] }
 0x1ae   : > { %s1683_s15 = smov %s1283_s16  ;;  %22 = sbr.rel (!%p20_p8) target bundleno = 11 (0xb), region = 104 }
 0x1b1   : > { %s1684_s16 = smov %s1679_s9 }
 0x1b5   :  { %743 = vsyncpa [#allocation4], 1 }
 0x1b6   :  { %745 = vsyncpa [#allocation4 + $0x1], 1 }
 0x1b7   :  { %746 = vsyncpa [#allocation7], 1 }
 0x1b8   :  { %748 = vsyncpa [#allocation7 + $0x1], 1 }
 0x1b9   :  { %749 = vsyncpa [#allocation5], 1 }
 0x1ba   :  { %751 = vsyncpa [#allocation5 + $0x1], 1 }

</bundles_post_ra>
